<compile_context>
chip_gen: v7x
topology: tpu7x:2x2x1
jax: 0.10.0
libtpu: 0.0.40
codegen_flags: <defaults>
</compile_context>

<pallas_src>
import random as _pyrandom

import jax
import jax.numpy as jnp
from jax.experimental import pallas as pl
from jax.experimental.pallas import tpu as pltpu


def _aug_disc_kernel(flag_ref, x_ref, w1_ref, w2_ref, out_ref, acc_ref):
    """One (hidden-tile j, reduction-tile k) grid step of D(flip?(images)).

    flag_ref : SMEM (1,) int32  scalar-prefetch flip flag (consumed by index_maps)
    x_ref    : VMEM (B_pad, TK) bf16  flattened (possibly-to-be-flipped) images
    w1_ref   : VMEM (TK, TJ)    bf16  selected (flipped or not) w1 tile
    w2_ref   : VMEM (1, TJ)     f32   second-layer weight slice
    out_ref  : VMEM (B_pad, 1)  f32   partial logit for this hidden tile
    acc_ref  : VMEM (B_pad, TJ) f32   accumulator over the reduction axis
    """
    del flag_ref  # selection already happened in the weight index_map
    k = pl.program_id(1)

    @pl.when(k == 0)
    def _init():
        acc_ref[...] = jnp.zeros_like(acc_ref)

    acc_ref[...] += jnp.dot(x_ref[...], w1_ref[...],
                            preferred_element_type=jnp.float32)

    @pl.when(k == pl.num_programs(1) - 1)
    def _epilogue():
        h = jnp.maximum(acc_ref[...], 0.0)                      # ReLU (VPU)
        # Second layer (HID x 1) as a VPU/XLU reduction, not a 1-column matmul.
        out_ref[...] = jnp.sum(h * w2_ref[...].astype(jnp.float32),
                               axis=-1, keepdims=True)


def _choose_tk(n, cap=4096):
    """Largest 128-multiple divisor of n that is <= cap (fits VMEM comfortably)."""
    limit = min(cap, n)
    t = (limit // 128) * 128
    while t >= 128:
        if n % t == 0:
            return t
        t -= 128
    return n  # fall back: whole axis (block == full dim is always legal)


def _aug_disc_call(flag, x_flat, w1_stacked, w2):
    """flag:(1,)i32  x_flat:(B_pad,N)bf16  w1_stacked:(2,N,HID)bf16  w2:(1,HID)f32."""
    b_pad, n = x_flat.shape
    _, _, hid = w1_stacked.shape
    tj = 128 if hid % 128 == 0 else hid
    tk = _choose_tk(n)
    j_tiles = hid // tj
    k_tiles = n // tk

    grid_spec = pltpu.PrefetchScalarGridSpec(
        num_scalar_prefetch=1,                       # flip flag -> SMEM, index_maps
        grid=(j_tiles, k_tiles),                     # (parallel hidden, reduction)
        in_specs=[
            pl.BlockSpec((b_pad, tk), lambda j, k, flag: (0, k)),
            # Flip flag selects which stacked weight to DMA — only one copy moves.
            pl.BlockSpec((None, tk, tj), lambda j, k, flag: (flag[0], k, j)),
            pl.BlockSpec((1, tj), lambda j, k, flag: (0, j)),
        ],
        out_specs=pl.BlockSpec((None, b_pad, 1), lambda j, k, flag: (j, 0, 0)),
        scratch_shapes=[pltpu.VMEM((b_pad, tj), jnp.float32)],
    )
    return pl.pallas_call(
        _aug_disc_kernel,
        out_shape=jax.ShapeDtypeStruct((j_tiles, b_pad, 1), jnp.float32),
        grid_spec=grid_spec,
        compiler_params=pltpu.CompilerParams(
            dimension_semantics=("parallel", "arbitrary"),
            vmem_limit_bytes=32 * 1024 * 1024,       # safe on v7x's smaller VMEM
        ),
    )(flag, x_flat, w1_stacked, w2)


class AugWrapperPallas:
    """JAX/Pallas port of lightweight_gan.aug.AugWrapper (with a synthetic D)."""

    def __init__(self, image_size, channels, hidden, key):
        self.C, self.H, self.W = channels, image_size, image_size
        n = channels * image_size * image_size
        k1, k2 = jax.random.split(key)
        w1 = jax.random.normal(k1, (n, hidden), jnp.float32) * 0.02
        # x[..., ::-1].reshape(B,-1) @ w1  ==  x.reshape(B,-1) @ w1_flip  (exact perm)
        w1_flip = (w1.reshape(channels * image_size, image_size, hidden)[:, ::-1, :]
                   .reshape(n, hidden))
        self.w1_stacked = jnp.stack([w1, w1_flip]).astype(jnp.bfloat16)  # (2, N, HID)
        self.w2 = (jax.random.normal(k2, (hidden,), jnp.float32) * 0.02).reshape(1, hidden)

    def __call__(self, images, prob=0.0, types=(), detach=False, rand_fn=None):
        if detach:
            images = jax.lax.stop_gradient(images)       # torch.no_grad analogue
        if rand_fn is None:
            rand_fn = _pyrandom.random                   # matches PyTorch's random()
        do_flip = 0
        if rand_fn() < prob:
            # random_hflip(images, prob=0.5): UNflipped if 0.5 > random(), else flip(W)
            if not (0.5 > rand_fn()):
                do_flip = 1
            # TODO(synk): DiffAugment(images, types=types) source not provided; with
            # the module's default types=[] it is the identity, applied here as such.

        b = images.shape[0]
        x_flat = images.reshape(b, -1).astype(jnp.bfloat16)   # NCHW flatten (glue)
        b_pad = max(8, ((b + 7) // 8) * 8)                     # sublane-align M
        if b_pad != b:
            x_flat = jnp.pad(x_flat, ((0, b_pad - b), (0, 0)))
        flag = jnp.array([do_flip], dtype=jnp.int32)

        partial = _aug_disc_call(flag, x_flat, self.w1_stacked, self.w2)  # (J,B_pad,1)
        # Combine the per-hidden-tile partial logits (tiny J x B array) and drop
        # the batch padding.
        return jnp.sum(partial, axis=0)[:b]


def _reference(images, w1_bf16, w2_f32, do_flip):
    x = images[..., ::-1] if do_flip else images
    xf = x.reshape(images.shape[0], -1).astype(jnp.bfloat16).astype(jnp.float32)
    h = jnp.maximum(xf @ w1_bf16.astype(jnp.float32), 0.0)
    return h @ w2_f32.reshape(-1, 1)


def _fake_rand(seq):
    it = iter(seq)
    return lambda: next(it)


if __name__ == "__main__":
    key = jax.random.PRNGKey(0)
    k_img, k_model = jax.random.split(key)
    B, C, H, W = 2, 4, 16, 16
    HID = 256  # 2 x 128-wide hidden tiles -> exercises the parallel grid axis

    images = jax.random.normal(k_img, (B, C, H, W), dtype=jnp.float32)
    wrapper = AugWrapperPallas(image_size=H, channels=C, hidden=HID, key=k_model)
    w1_bf16 = wrapper.w1_stacked[0]

    # Default path: prob = 0.0 -> no augmentation, just D(images).
    out_plain = jax.block_until_ready(wrapper(images, prob=0.0))
    assert out_plain.shape == (B, 1)
    ref_plain = _reference(images, w1_bf16, wrapper.w2, do_flip=False)
    assert jnp.allclose(out_plain, ref_plain, rtol=2e-2, atol=2e-2), "plain path mismatch"

    # Augmentation path, flip branch taken (rands: 0.0 < prob, then 0.9 -> flip).
    out_flip = jax.block_until_ready(
        wrapper(images, prob=1.0, detach=True, rand_fn=_fake_rand([0.0, 0.9])))
    ref_flip = _reference(images, w1_bf16, wrapper.w2, do_flip=True)
    assert jnp.allclose(out_flip, ref_flip, rtol=2e-2, atol=2e-2), "flip path mismatch"

    # Augmentation path, flip branch NOT taken (rands: 0.0 < prob, then 0.1 -> no flip).
    out_noflip = jax.block_until_ready(
        wrapper(images, prob=1.0, rand_fn=_fake_rand([0.0, 0.1])))
    assert jnp.allclose(out_noflip, ref_plain, rtol=2e-2, atol=2e-2), "no-flip aug mismatch"

    print("KERNEL_OK")
</pallas_src>

<mosaic_0001>
module attributes {stable_mosaic.version = 11 : i64} {
  func.func @_aug_disc_kernel(%arg0: i32, %arg1: i32, %arg2: memref<1xi32, #tpu.memory_space<smem>>, %arg3: memref<8x1024xbf16, #tpu.memory_space<vmem>>, %arg4: memref<1x1024x128xbf16, #tpu.memory_space<vmem>>, %arg5: memref<1x128xf32, #tpu.memory_space<vmem>>, %arg6: memref<1x8x1xf32, #tpu.memory_space<vmem>>, %arg7: memref<8x128xf32, #tpu.memory_space<vmem>>) attributes {dimension_semantics = [#tpu.dimension_semantics<parallel>, #tpu.dimension_semantics<arbitrary>], iteration_bounds = array<i64: 2, 1>, scalar_prefetch = 1 : i64, scratch_operands = 1 : i64, tpu.core_type = #tpu.core_type<tc>, window_params = [{transform_indices = @transform_0, window_bounds = array<i64: 8, 1024>}, {transform_indices = @transform_1, window_bounds = array<i64: 1, 1024, 128>}, {transform_indices = @transform_2, window_bounds = array<i64: 1, 128>}, {transform_indices = @transform_3, window_bounds = array<i64: 1, 8, 1>}]} {
    %c0_i32 = arith.constant 0 : i32
    %0 = arith.cmpi eq, %arg1, %c0_i32 : i32
    %1 = arith.extui %0 : i1 to i32
    %c0_i32_0 = arith.constant 0 : i32
    %2 = arith.cmpi ne, %1, %c0_i32_0 : i32
    scf.if %2 {
      %cst_11 = arith.constant 0.000000e+00 : f32
      %13 = vector.broadcast %cst_11 : f32 to vector<8x128xf32>
      %c0_12 = arith.constant 0 : index
      %c0_13 = arith.constant 0 : index
      %14 = vector.load %arg7[%c0_12, %c0_13] : memref<8x128xf32, #tpu.memory_space<vmem>>, vector<8x128xf32>
      tpu.vector_store %arg7[%c0_12, %c0_13], %13 {strides = array<i32>} : memref<8x128xf32, #tpu.memory_space<vmem>>, vector<8x128xf32>,
    } else {
    }
    %c0 = arith.constant 0 : index
    %c0_1 = arith.constant 0 : index
    %3 = vector.load %arg7[%c0, %c0_1] : memref<8x128xf32, #tpu.memory_space<vmem>>, vector<8x128xf32>
    %c0_2 = arith.constant 0 : index
    %c0_3 = arith.constant 0 : index
    %4 = vector.load %arg3[%c0_2, %c0_3] : memref<8x1024xbf16, #tpu.memory_space<vmem>>, vector<8x1024xbf16>
    %c0_4 = arith.constant 0 : index
    %c0_5 = arith.constant 0 : index
    %c0_6 = arith.constant 0 : index
    %5 = vector.load %arg4[%c0_4, %c0_5, %c0_6] : memref<1x1024x128xbf16, #tpu.memory_space<vmem>>, vector<1x1024x128xbf16>
    %6 = vector.shape_cast %5 : vector<1x1024x128xbf16> to vector<1024x128xbf16>
    %cst = arith.constant dense<0.000000e+00> : vector<8x128xf32>
    %7 = tpu.matmul %4, %6, %cst {dimension_numbers = #tpu.dot_dimension_numbers<[1], [0], [0], [1], [0, 0, 1, 1], [], []>} : vector<8x1024xbf16>, vector<1024x128xbf16>, vector<8x128xf32> -> vector<8x128xf32>
    %8 = arith.addf %3, %7 : vector<8x128xf32>
    %c0_7 = arith.constant 0 : index
    %c0_8 = arith.constant 0 : index
    %9 = vector.load %arg7[%c0_7, %c0_8] : memref<8x128xf32, #tpu.memory_space<vmem>>, vector<8x128xf32>
    tpu.vector_store %arg7[%c0_7, %c0_8], %8 {strides = array<i32>} : memref<8x128xf32, #tpu.memory_space<vmem>>, vector<8x128xf32>,
    %c0_i32_9 = arith.constant 0 : i32
    %10 = arith.cmpi eq, %arg1, %c0_i32_9 : i32
    %11 = arith.extui %10 : i1 to i32
    %c0_i32_10 = arith.constant 0 : i32
    %12 = arith.cmpi ne, %11, %c0_i32_10 : i32
    scf.if %12 {
      %c0_11 = arith.constant 0 : index
      %c0_12 = arith.constant 0 : index
      %13 = vector.load %arg7[%c0_11, %c0_12] : memref<8x128xf32, #tpu.memory_space<vmem>>, vector<8x128xf32>
      %cst_13 = arith.constant 0.000000e+00 : f32
      %14 = vector.broadcast %cst_13 : f32 to vector<8x128xf32>
      %15 = arith.maximumf %13, %14 : vector<8x128xf32>
      %c0_14 = arith.constant 0 : index
      %c0_15 = arith.constant 0 : index
      %16 = vector.load %arg5[%c0_14, %c0_15] : memref<1x128xf32, #tpu.memory_space<vmem>>, vector<1x128xf32>
      %17 = vector.broadcast %16 : vector<1x128xf32> to vector<8x128xf32>
      %18 = arith.mulf %15, %17 : vector<8x128xf32>
      %cst_16 = arith.constant dense<0.000000e+00> : vector<8xf32>
      %19 = vector.multi_reduction <add>, %18, %cst_16 [1] : vector<8x128xf32> to vector<8xf32>
      %20 = vector.shape_cast %19 : vector<8xf32> to vector<8x1xf32>
      %c0_17 = arith.constant 0 : index
      %c0_18 = arith.constant 0 : index
      %c0_19 = arith.constant 0 : index
      %21 = vector.load %arg6[%c0_17, %c0_18, %c0_19] : memref<1x8x1xf32, #tpu.memory_space<vmem>>, vector<1x8x1xf32>
      %22 = vector.shape_cast %21 : vector<1x8x1xf32> to vector<8x1xf32>
      %23 = vector.shape_cast %20 : vector<8x1xf32> to vector<1x8x1xf32>
      tpu.vector_store %arg6[%c0_17, %c0_18, %c0_19], %23 {strides = array<i32>} : memref<1x8x1xf32, #tpu.memory_space<vmem>>, vector<1x8x1xf32>,
    } else {
    }
    return
  }
  func.func @transform_0(%arg0: i32, %arg1: i32, %arg2: memref<1xi32, #tpu.memory_space<smem>>) -> (i32, i32) {
    %c0_i32 = arith.constant 0 : i32
    %c0_i32_0 = arith.constant 0 : i32
    return %c0_i32, %arg1 : i32, i32
  }
  func.func @transform_1(%arg0: i32, %arg1: i32, %arg2: memref<1xi32, #tpu.memory_space<smem>>) -> (i32, i32, i32) {
    %c0 = arith.constant 0 : index
    %0 = memref.load %arg2[%c0] : memref<1xi32, #tpu.memory_space<smem>>
    %c0_i32 = arith.constant 0 : i32
    return %0, %arg1, %arg0 : i32, i32, i32
  }
  func.func @transform_2(%arg0: i32, %arg1: i32, %arg2: memref<1xi32, #tpu.memory_space<smem>>) -> (i32, i32) {
    %c0_i32 = arith.constant 0 : i32
    %c0_i32_0 = arith.constant 0 : i32
    return %c0_i32, %arg0 : i32, i32
  }
  func.func @transform_3(%arg0: i32, %arg1: i32, %arg2: memref<1xi32, #tpu.memory_space<smem>>) -> (i32, i32, i32) {
    %c0_i32 = arith.constant 0 : i32
    %c0_i32_0 = arith.constant 0 : i32
    %c0_i32_1 = arith.constant 0 : i32
    return %arg0, %c0_i32, %c0_i32_0 : i32, i32, i32
  }
}

</mosaic_0001>

<bundles_post_ra>
// kernel: tpu_custom_call.1
= control target key start
LH: loop header
LB: loop body
LE: loop exit
PB: predicated region body
PF: predicated region fallthrough
CT: control target
= control target key end

     0   :  { %s1778_s0 = inlined_call_operand.<no memory space> [shape: s32[1], index: 0, kind: input, shape index: {}]   ;;  %s1779_s1 = inlined_call_operand.hbm [shape: bf16[8,1024], index: 1, kind: input, shape index: {}]   ;;  %s1780_s2 = inlined_call_operand.hbm [shape: bf16[2,1024,256], index: 2, kind: input, shape index: {}]   ;;  %s1781_s3 = inlined_call_operand.vmem [shape: f32[1,256], index: 3, kind: input, shape index: {}]   ;;  %s1782_s4 = inlined_call_operand.vmem [shape: f32[2,8,1], index: 4, kind: output, shape index: {}]  }
   0x1   :  { %9 = sst [smem:[#allocation4]] %s1778_s0 }
   0x2   :  { %10 = vsyncpa [#allocation6], 0 }
   0x3   :  { %11 = vsyncpa [#allocation8], 0 }
   0x4   :  { %13 = vsyncpa [#allocation8 + $0x1], 0  ;;  %s1545_s17 = smov 0   ;;  %s1547_s18 = smov 0  }
   0x5   :  { %s1549_s19 = smov 0   ;;  %s1551_s20 = smov 0  }
   0x6   :  { %s1553_s21 = smov 0   ;;  %s1555_s22 = smov 0  }
   0x7 LB: > { %s1082_s0 = sadd.s32 4294967295, %s1510_s22   ;;  %s70_s23 = sadd.s32 1, %s1498_s19  ;;  %s1510_s22 = sphi %s1555_s22, %s19_s22   ;;  %s1506_s21 = sphi %s1553_s21, %s1802_s21   ;;  %s1502_s20 = sphi %s1551_s20, %s1801_s20   ;;  %s1498_s19 = sphi %s1549_s19, %s1800_s19   ;;  %s1494_s18 = sphi %s1547_s18, %s1799_s18   ;;  %s1490_s17 = sphi %s1545_s17, %s1798_s17  }
   0x8   : > { %p77_p0 = scmp.ne.s32.totalorder %s1498_s19, %s1494_s18  ;;  %p78_p1 = scmp.eq.s32.totalorder %s1510_s22, 0 }
   0x9   : > { %p83_p2 = scmp.ne.s32.totalorder %s1494_s18, %s1490_s17  ;;  %p1579_p3 = scmp.eq.s32.totalorder %s1082_s0, 0 }
   0xa   : > { %p79_p4 = por %p78_p1, %p77_p0  ;;  %p1084_p5 = scmp.ge.s32.totalorder %s1510_s22, 1 }
   0xb   : > { %s1788_s24 = scalar_select %p1579_p3, 1, 0 }
   0xc   : > { %p1586_p6 = por %p1579_p3, %p83_p2  ;;  %p146_p7 = scmp.lt.s32.totalorder %s1510_s22, 3 }
   0xd   : > { %s1512_s27 = smov [#allocation5]   ;;  %p1272_p10 = scmp.lt.s32.totalorder %s1510_s22, 2 }
   0xe   : > { %s1789_s25 = scalar_select %p1586_p6, 1, 0 }
   0xf   : > { %p1591_p8 = pnand %p1084_p5, %p146_p7  ;;  %s162_s28 = sshll.u32 %s1512_s27, 4  ;;  %s163_s28 = int_to_ptr.vmem [resolvable:$true] %s162_s28 }
  0x10   : > { %s61_s29 = sld [smem:[#allocation4]]  ;;  %p1604_p12 = pnand %p1272_p10, %p79_p4 }
  0x11   : > { %s1790_s26 = scalar_select %p1591_p8, 1, 0 }
  0x12   : > { %p1263_p9 = pneg %p1591_p8  ;;  %s173_s6 = sand.u32 1, %s1498_s19  }
  0x13   : > { %s1792_s5 = scalar_select %p1604_p12, 1, 0 }
  0x14   : > { %p1600_p11 = pnand %p1263_p9, %p1579_p3  ;;  %s1398_s9 = scalar_lea.hbm %s1779_s1, 512 }
  0x15   : > { %p1399_p13 = scmp.ne.s32.totalorder %s1779_s1, %s1398_s9  ;;  %p1405_p4 = scmp.lt.u32.totalorder %s1398_s9, %s1779_s1 }
  0x16   : > { %p1400_p0 = pneg %p1600_p11 }
  0x18   : > { %p1401_p1 = pnand %p1400_p0, %p1399_p13 }
  0x1a   : > { %p1402_p2 = pneg %p1401_p1 }
  0x1c   : > { %p1407_p5 = pnand %p1405_p4, %p1402_p2 }
  0x1e   : > { %1410 = shalt.err (!%p1407_p5)
}
  0x1f   : > { %s1411_s14 = scalar_lea.vmem %s163_s28, 512  ;;  %p1419_p6 = scmp.lt.s32.totalorder %s163_s28, %s163_s28 }
  0x20   : > { %p1412_p7 = scmp.ne.s32.totalorder %s163_s28, %s1411_s14  ;;  %p1420_p3 = scmp.lt.s32.totalorder %s1411_s14, %s1411_s14 }
  0x22   : > { %p1414_p9 = pnand %p1412_p7, %p1400_p0  ;;  %p1421_p8 = por %p1420_p3, %p1419_p6 }
  0x24   : > { %p1415_p10 = pneg %p1414_p9 }
  0x26   : > { %p1422_p12 = pnand %p1421_p8, %p1415_p10 }
  0x28   : > { %1425 = shalt.err (!%p1422_p12)
}
  0x29   : > { %1266 = dma.hbm_to_vmem [thread:$0]  (!%p1600_p11), %s1779_s1, 512, %s163_s28, [#allocation6]  }
  0x2a   : > { %s31_s17 = sadd.s32 1, %s1506_s21  ;;  %s1087_s0 = sshll.u32 %s173_s6, 9 }
  0x2b   : > { %p33_p13 = scmp.ge.s32.totalorder %s31_s17, 2  ;;  %s1088_s27 = sshll.u32 %s61_s29, 8 }
  0x2c   : > { %s186_s30 = sadd.s32 %s1506_s21, %s1088_s27  ;;  %s177_s28 = scalar_lea.vmem [#allocation7], %s1087_s0 }
  0x2d   : > { %s1804_s17 = smov (%p33_p13, %s31_s17), 0  ;;  %s1089_s8 = sshll.u32 %s186_s30, 6 }
  0x2e   : > { %s66_s7 = ssub.s32 %s1506_s21, %s1804_s17  ;;  %s1636_s11 = scalar_lea.hbm %s1780_s2, %s1089_s8 }
  0x2f   : > { %p68_p3 = scmp.eq.s32.totalorder %s66_s7, 0  ;;  %s189_s12 = sshll.u32 %s177_s28, 4  ;;  %s1638_s12 = int_to_ptr.vmem [resolvable:$true] %s189_s12 }
  0x30   : > { %s1647_s13 = scalar_lea.sflag [#allocation8], %s173_s6  ;;  %s1426_s14 = scalar_lea.hbm %s1636_s11, 8192 }
  0x31   : > { %s1643_s29 = scalar_select %p68_p3, %s1498_s19, %s70_s23  }
  0x32   : > { %p1427_p6 = scmp.ne.s32.totalorder %s1636_s11, %s1426_s14  ;;  %p1793_p8 = scmp.ne.s32.totalorder %s1792_s5, 0 }
  0x33   : > { %s1431_s0 = scalar_lea.hbm %s1780_s2, 32768  ;;  %p1432_p1 = scmp.lt.u32.totalorder %s1636_s11, %s1780_s2 }
  0x34   : > { %p1428_p11 = pneg %p1793_p8  ;;  %p1433_p2 = scmp.lt.u32.totalorder %s1431_s0, %s1426_s14 }
  0x35   : > { %p1435_p5 = scmp.lt.u32.totalorder %s1426_s14, %s1636_s11 }
  0x36   : > { %p1429_p12 = pnand %p1428_p11, %p1427_p6  ;;  %p1434_p4 = por %p1433_p2, %p1432_p1 }
  0x38   : > { %p1430_p0 = pneg %p1429_p12  ;;  %p1436_p7 = por %p1435_p5, %p1434_p4 }
  0x3a   : > { %p1437_p9 = pnand %p1436_p7, %p1430_p0 }
  0x3c   : > { %1440 = shalt.err (!%p1437_p9)
}
  0x3d   : > { %s1441_s23 = scalar_lea.vmem %s1638_s12, 8192  ;;  %s1513_s6 = smov [#allocation7]  }
  0x3e   : > { %p1442_p10 = scmp.ne.s32.totalorder %s1638_s12, %s1441_s23  ;;  %s1446_s7 = sshll.u32 %s1513_s6, 4  ;;  %s1447_s7 = int_to_ptr.vmem [resolvable:$false] %s1446_s7 }
  0x3f   : > { %s1448_s8 = scalar_lea.vmem %s1447_s7, 16384  ;;  %p1449_p6 = scmp.lt.s32.totalorder %s1638_s12, %s1447_s7 }
  0x40   : > { %p1444_p13 = pnand %p1442_p10, %p1428_p11  ;;  %p1450_p12 = scmp.lt.s32.totalorder %s1448_s8, %s1441_s23 }
  0x42   : > { %p1445_p3 = pneg %p1444_p13  ;;  %p1451_p1 = por %p1450_p12, %p1449_p6 }
  0x44   : > { %p1452_p2 = pnand %p1451_p1, %p1445_p3 }
  0x46   : > { %1455 = shalt.err (!%p1452_p2)
}
  0x47   : > { %s1514_s9 = smov 128   ;;  %s1515_s10 = smov 64  }
  0x48   : > { %s1516_s28 = smov 4   ;;  %p1794_p11 = scmp.ne.s32.totalorder %s1790_s26, 0 }
  0x49   : > { %1270 = dma.hbm_to_vmem [thread:$0]  (!%p1793_p8), %s1636_s11, 8192, %s1638_s12, %s1647_s13, %s1514_s9, %s1515_s10, %s1516_s28  }
  0x4a   : > { %207 = sbr.rel (%p1794_p11) target bundleno = 518 (0x206), region = 32  ;;  %p1795_p0 = scmp.ne.s32.totalorder (!%p1794_p11), %s1788_s24, 0 }
  0x51   : > { %1481 = dma.done.wait (%p1795_p0), [#allocation6], 512  }
  0x52   : > { %1483 = vsyncadd (%p1795_p0), [#allocation6], 4294966784  ;;  %s213_s14 = sand.u32 1, %s1494_s18   ;;  %p1796_p4 = scmp.ne.s32.totalorder %s1789_s25, 0 }
  0x53   : > { %s1092_s15 = sshll.u32 %s213_s14, 9  ;;  %s214_s16 = scalar_lea.sflag [#allocation8], %s213_s14 }
  0x54   : > { %s1682_s0 = scalar_lea.vmem [#allocation7], %s1092_s15 }
  0x55   : > { %1485 = dma.done.wait (%p1796_p4), %s214_s16, 8192  }
  0x56   : > { %1487 = vsyncadd (%p1796_p4), %s214_s16, 4294959104  ;;  %v1326_v0 = vld [vmem:[%s1682_s0 + $0x40] sm:$0xff]   ;;  %v1330_v4 = vld [vmem:[%s1682_s0 + $0x48] sm:$0xff]   ;;  %p245_p8 = scmp.lt.s32.totalorder %s1502_s20, 1  ;;  %vm980_vm0 = vcmask 7168  }
  0x57   : > { %v1327_v1 = vld [vmem:[%s1682_s0 + $0xc0] sm:$0xff]   ;;  %1169 = vmatprep.subr.bf16.mxu0 %v1326_v0  ;;  %v1331_v5 = vld [vmem:[%s1682_s0 + $0xc8] sm:$0xff]   ;;  %v1334_v8 = vld [vmem:[%s1682_s0 + $0x50] sm:$0xff]  }
  0x58   : > { %v1328_v2 = vld [vmem:[%s1682_s0] sm:$0xff]   ;;  %1191 = vmatprep.subr.bf16.mxu1 %v1327_v1  ;;  %v1332_v6 = vld [vmem:[%s1682_s0 + $0x8] sm:$0xff]   ;;  %v1335_v9 = vld [vmem:[%s1682_s0 + $0xd0] sm:$0xff]   ;;  %s1806_s20 = smov (!%p245_p8, %s1502_s20), 1 }
  0x59   : > { %v1329_v3 = vld [vmem:[%s1682_s0 + $0x80] sm:$0xff]   ;;  %1170 = vmatpush3.bf16.msra.mxu0 %v1328_v2  ;;  %v1333_v7 = vld [vmem:[%s1682_s0 + $0x88] sm:$0xff]   ;;  %v1336_v10 = vld [vmem:[%s1682_s0 + $0x10] sm:$0xff]   ;;  %s247_s26 = scalar_lea.vmem %s1781_s3, %s1806_s20  ;;  %s1093_s5 = sshll.u32 %s1806_s20, 3 }
  0x5a   : > { %1192 = vmatpush3.bf16.msra.mxu1 %v1329_v3  ;;  %1171 = vmatprep.subr.bf16.mxu0 %v1330_v4  ;;  %v1337_v11 = vld [vmem:[%s1682_s0 + $0x90] sm:$0xff]   ;;  %v1338_v12 = vld [vmem:[%s1682_s0 + $0x58] sm:$0xff]   ;;  %v1342_v16 = vld [vmem:[%s1682_s0 + $0x60] sm:$0xff]   ;;  %s251_s13 = scalar_lea.vmem %s1782_s4, %s1093_s5 }
  0x5b   : > { %1193 = vmatprep.subr.bf16.mxu1 %v1331_v5  ;;  %v1339_v13 = vld [vmem:[%s1682_s0 + $0xd8] sm:$0xff]   ;;  %v1343_v17 = vld [vmem:[%s1682_s0 + $0xe0] sm:$0xff]   ;;  %v1346_v20 = vld [vmem:[%s1682_s0 + $0x68] sm:$0xff]  }
  0x5c   : > { %v1340_v14 = vld [vmem:[%s1682_s0 + $0x18] sm:$0xff]   ;;  %v1344_v18 = vld [vmem:[%s1682_s0 + $0x20] sm:$0xff]   ;;  %v1347_v21 = vld [vmem:[%s1682_s0 + $0xe8] sm:$0xff]  }
  0x5d   : > { %1172 = vmatpush3.bf16.msra.mxu0 %v1332_v6  ;;  %v1341_v15 = vld [vmem:[%s1682_s0 + $0x98] sm:$0xff]   ;;  %v1345_v19 = vld [vmem:[%s1682_s0 + $0xa0] sm:$0xff]   ;;  %v1348_v22 = vld [vmem:[%s1682_s0 + $0x28] sm:$0xff]  }
  0x5e   : > { %1194 = vmatpush3.bf16.msra.mxu1 %v1333_v7  ;;  %1173 = vmatprep.subr.bf16.mxu0 %v1334_v8  ;;  %v1349_v23 = vld [vmem:[%s1682_s0 + $0xa8] sm:$0xff]   ;;  %v1350_v24 = vld [vmem:[%s1682_s0 + $0x70] sm:$0xff]   ;;  %v1354_v28 = vld [vmem:[%s1682_s0 + $0x78] sm:$0xff]  }
  0x5f   : > { %1195 = vmatprep.subr.bf16.mxu1 %v1335_v9  ;;  %v1351_v25 = vld [vmem:[%s1682_s0 + $0xf0] sm:$0xff]   ;;  %v1355_v29 = vld [vmem:[%s1682_s0 + $0xf8] sm:$0xff]   ;;  %v259_v32 = vld [vmem:[#allocation5] sm:$0xff] }
  0x60   : > { %v1352_v26 = vld [vmem:[%s1682_s0 + $0x30] sm:$0xff]   ;;  %v1356_v30 = vld [vmem:[%s1682_s0 + $0x38] sm:$0xff]   ;;  %v260_v33 = vld [vmem:[#allocation5 + $0x8] sm:$0xff]  ;;  %v1094_v34 = vcombine.low %v259_v32, %v259_v32  ;;  %v1095_v35 = vcombine.high %v259_v32, %v259_v32 }
  0x61   : > { %1174 = vmatpush3.bf16.msra.mxu0 %v1336_v10  ;;  %v1353_v27 = vld [vmem:[%s1682_s0 + $0xb0] sm:$0xff]   ;;  %v1357_v31 = vld [vmem:[%s1682_s0 + $0xb8] sm:$0xff]   ;;  %v1096_v36 = vcombine.low %v260_v33, %v260_v33  ;;  %v1097_v37 = vcombine.high %v260_v33, %v260_v33  ;;  %v1362_v38 = vld [vmem:[%s1682_s0 + $0x140] sm:$0xff]  }
  0x62   : > { %1196 = vmatpush3.bf16.msra.mxu1 %v1337_v11  ;;  %1175 = vmatprep.subr.bf16.mxu0 %v1338_v12  ;;  %v1363_v39 = vld [vmem:[%s1682_s0 + $0x1c0] sm:$0xff]   ;;  %v1366_v42 = vld [vmem:[%s1682_s0 + $0x148] sm:$0xff]   ;;  %v1370_v46 = vld [vmem:[%s1682_s0 + $0x150] sm:$0xff]  }
  0x63   : > { %1197 = vmatprep.subr.bf16.mxu1 %v1339_v13  ;;  %835 = vmatprep.mubr.bf16.mxu0 %v1095_v35  ;;  %v1364_v40 = vld [vmem:[%s1682_s0 + $0x100] sm:$0xff]   ;;  %v1367_v43 = vld [vmem:[%s1682_s0 + $0x1c8] sm:$0xff]   ;;  %v1371_v47 = vld [vmem:[%s1682_s0 + $0x1d0] sm:$0xff]  }
  0x64   : > { %875 = vmatprep.mubr.bf16.mxu1 %v1097_v37  ;;  %v1365_v41 = vld [vmem:[%s1682_s0 + $0x180] sm:$0xff]   ;;  %v1368_v44 = vld [vmem:[%s1682_s0 + $0x108] sm:$0xff]   ;;  %v1372_v48 = vld [vmem:[%s1682_s0 + $0x110] sm:$0xff]  }
  0x65   : > { %1176 = vmatpush3.bf16.msra.mxu0 %v1340_v14  ;;  %v1369_v45 = vld [vmem:[%s1682_s0 + $0x188] sm:$0xff]   ;;  %v1373_v49 = vld [vmem:[%s1682_s0 + $0x190] sm:$0xff]   ;;  %v1374_v50 = vld [vmem:[%s1682_s0 + $0x158] sm:$0xff]  }
  0x66   : > { %1198 = vmatpush3.bf16.msra.mxu1 %v1341_v15  ;;  %1177 = vmatprep.subr.bf16.mxu0 %v1342_v16  ;;  %v1375_v51 = vld [vmem:[%s1682_s0 + $0x1d8] sm:$0xff]   ;;  %v1378_v54 = vld [vmem:[%s1682_s0 + $0x160] sm:$0xff]   ;;  %v1382_v58 = vld [vmem:[%s1682_s0 + $0x168] sm:$0xff]  }
  0x67   : > { %1199 = vmatprep.subr.bf16.mxu1 %v1343_v17  ;;  %v1376_v52 = vld [vmem:[%s1682_s0 + $0x118] sm:$0xff]   ;;  %v1379_v55 = vld [vmem:[%s1682_s0 + $0x1e0] sm:$0xff]   ;;  %v1383_v59 = vld [vmem:[%s1682_s0 + $0x1e8] sm:$0xff]  }
  0x68   : > { %v1377_v53 = vld [vmem:[%s1682_s0 + $0x198] sm:$0xff]   ;;  %v1380_v56 = vld [vmem:[%s1682_s0 + $0x120] sm:$0xff]   ;;  %v1384_v60 = vld [vmem:[%s1682_s0 + $0x128] sm:$0xff]  }
  0x69   : > { %1178 = vmatpush3.bf16.msra.mxu0 %v1344_v18  ;;  %v1381_v57 = vld [vmem:[%s1682_s0 + $0x1a0] sm:$0xff]   ;;  %v1385_v61 = vld [vmem:[%s1682_s0 + $0x1a8] sm:$0xff]   ;;  %v1386_v62 = vld [vmem:[%s1682_s0 + $0x170] sm:$0xff]  }
  0x6a   : > { %1200 = vmatpush3.bf16.msra.mxu1 %v1345_v19  ;;  %1179 = vmatprep.subr.bf16.mxu0 %v1346_v20  ;;  %v1387_v63 = vld [vmem:[%s1682_s0 + $0x1f0] sm:$0xff]   ;;  %v1390_v2 = vld [vmem:[%s1682_s0 + $0x178] sm:$0xff]   ;;  %v1166_v35 = vld [vmem:[%s247_s26] ss:$0 sm:$0xff] }
  0x6b   : > { %1201 = vmatprep.subr.bf16.mxu1 %v1347_v21  ;;  %v1388_v0 = vld [vmem:[%s1682_s0 + $0x130] sm:$0xff]   ;;  %v1391_v3 = vld [vmem:[%s1682_s0 + $0x1f8] sm:$0xff]  }
  0x6c   : > { %v1389_v1 = vld [vmem:[%s1682_s0 + $0x1b0] sm:$0xff]   ;;  %v1392_v4 = vld [vmem:[%s1682_s0 + $0x138] sm:$0xff]  }
  0x6d   : > { %1180 = vmatpush3.bf16.msra.mxu0 %v1348_v22  ;;  %v1393_v5 = vld [vmem:[%s1682_s0 + $0x1b8] sm:$0xff]   ;;  %v261_v6 = vld [vmem:[#allocation5 + $0x10] sm:$0xff] }
  0x6e   : > { %1202 = vmatpush3.bf16.msra.mxu1 %v1349_v23  ;;  %1181 = vmatprep.subr.bf16.mxu0 %v1350_v24  ;;  %v1098_v7 = vcombine.low %v261_v6, %v261_v6  ;;  %v1099_v8 = vcombine.high %v261_v6, %v261_v6  ;;  %v262_v9 = vld [vmem:[#allocation5 + $0x18] sm:$0xff] }
  0x6f   : > { %1203 = vmatprep.subr.bf16.mxu1 %v1351_v25  ;;  %v1100_v10 = vcombine.low %v262_v9, %v262_v9  ;;  %v1101_v11 = vcombine.high %v262_v9, %v262_v9 }
  0x71   : > { %1182 = vmatpush3.bf16.msra.mxu0 %v1352_v26 }
  0x72   : > { %1204 = vmatpush3.bf16.msra.mxu1 %v1353_v27  ;;  %1183 = vmatprep.subr.bf16.mxu0 %v1354_v28 }
  0x73   : > { %1205 = vmatprep.subr.bf16.mxu1 %v1355_v29 }
  0x75   : > { %1184 = vmatpush3.bf16.msra.mxu0 %v1356_v30 }
  0x76   : > { %1206 = vmatpush3.bf16.msra.mxu1 %v1357_v31  ;;  %1213 = vmatprep.subr.bf16.mxu0 %v1362_v38 }
  0x77   : > { %1235 = vmatprep.subr.bf16.mxu1 %v1363_v39 }
  0x78   : > { %836 = vmatmul.mubr.bf16.vlgmr.msra.gmra.mrb[0].mxu0 %v1094_v34 }
  0x79   : > { %876 = vmatmul.mubr.bf16.vlgmr.msra.gmra.mrb[0].mxu1 %v1096_v36  ;;  %1214 = vmatpush3.bf16.msra.mxu0 %v1364_v40 }
  0x7a   : > { %1236 = vmatpush3.bf16.msra.mxu1 %v1365_v41  ;;  %1215 = vmatprep.subr.bf16.mxu0 %v1366_v42 }
  0x7b   : > { %1237 = vmatprep.subr.bf16.mxu1 %v1367_v43  ;;  %915 = vmatprep.mubr.bf16.mxu0 %v1099_v8 }
  0x7c   : > { %955 = vmatprep.mubr.bf16.mxu1 %v1101_v11 }
  0x7d   : > { %1216 = vmatpush3.bf16.msra.mxu0 %v1368_v44 }
  0x7e   : > { %1238 = vmatpush3.bf16.msra.mxu1 %v1369_v45  ;;  %1217 = vmatprep.subr.bf16.mxu0 %v1370_v46 }
  0x7f   : > { %1239 = vmatprep.subr.bf16.mxu1 %v1371_v47 }
  0x81   : > { %1218 = vmatpush3.bf16.msra.mxu0 %v1372_v48 }
  0x82   : > { %1240 = vmatpush3.bf16.msra.mxu1 %v1373_v49  ;;  %1219 = vmatprep.subr.bf16.mxu0 %v1374_v50 }
  0x83   : > { %1241 = vmatprep.subr.bf16.mxu1 %v1375_v51 }
  0x85   : > { %1220 = vmatpush3.bf16.msra.mxu0 %v1376_v52 }
  0x86   : > { %1242 = vmatpush3.bf16.msra.mxu1 %v1377_v53  ;;  %1221 = vmatprep.subr.bf16.mxu0 %v1378_v54 }
  0x87   : > { %1243 = vmatprep.subr.bf16.mxu1 %v1379_v55 }
  0x89   : > { %1222 = vmatpush3.bf16.msra.mxu0 %v1380_v56 }
  0x8a   : > { %1244 = vmatpush3.bf16.msra.mxu1 %v1381_v57  ;;  %1223 = vmatprep.subr.bf16.mxu0 %v1382_v58 }
  0x8b   : > { %1245 = vmatprep.subr.bf16.mxu1 %v1383_v59 }
  0x8d   : > { %1224 = vmatpush3.bf16.msra.mxu0 %v1384_v60 }
  0x8e   : > { %1246 = vmatpush3.bf16.msra.mxu1 %v1385_v61  ;;  %1225 = vmatprep.subr.bf16.mxu0 %v1386_v62 }
  0x8f   : > { %1247 = vmatprep.subr.bf16.mxu1 %v1387_v63 }
  0x91   : > { %1226 = vmatpush3.bf16.msra.mxu0 %v1388_v0 }
  0x92   : > { %1248 = vmatpush3.bf16.msra.mxu1 %v1389_v1  ;;  %1227 = vmatprep.subr.bf16.mxu0 %v1390_v2 }
  0x93   : > { %1249 = vmatprep.subr.bf16.mxu1 %v1391_v3 }
  0x95   : > { %1228 = vmatpush3.bf16.msra.mxu0 %v1392_v4 }
  0x96   : > { %1250 = vmatpush3.bf16.msra.mxu1 %v1393_v5 }
  0x98   : > { %916 = vmatmul.mubr.bf16.vlgmr.msra.gmra.mrb[4].mxu0 %v1098_v7 }
  0x99   : > { %956 = vmatmul.mubr.bf16.vlgmr.msra.gmra.mrb[4].mxu1 %v1100_v10 }
 0x14b   : > { %v1185_v12 = vpop.f32.mrb[0].mxu0 }
 0x14c   : > { %v1207_v13 = vpop.f32.mrb[0].mxu1  ;;  %v1186_v14 = vpop.f32.mrb[1].mxu0 }
 0x14d   : > { %v1208_v15 = vpop.f32.mrb[1].mxu1  ;;  %v1187_v16 = vadd.f32 %v1186_v14, %v1185_v12  ;;  %v1188_v18 = vpop.f32.mrb[2].mxu0 }
 0x14e   : > { %v1209_v17 = vadd.f32 %v1208_v15, %v1207_v13  ;;  %v1210_v19 = vpop.f32.mrb[2].mxu1  ;;  %v1189_v20 = vpop.f32.mrb[3].mxu0 }
 0x14f   : > { %v1211_v21 = vpop.f32.mrb[3].mxu1 }
 0x150   : > { %v878_v22 = vadd.f32 %v1209_v17, %v1187_v16 }
 0x16b   : > { %v1229_v23 = vpop.f32.mrb[4].mxu0 }
 0x16c   : > { %v1251_v24 = vpop.f32.mrb[4].mxu1  ;;  %v1230_v25 = vpop.f32.mrb[5].mxu0 }
 0x16d   : > { %v1252_v26 = vpop.f32.mrb[5].mxu1  ;;  %v1231_v27 = vadd.f32 %v1230_v25, %v1229_v23  ;;  %v1232_v29 = vpop.f32.mrb[6].mxu0 }
 0x16e   : > { %v1253_v28 = vadd.f32 %v1252_v26, %v1251_v24  ;;  %v1254_v30 = vpop.f32.mrb[6].mxu1  ;;  %v1233_v31 = vpop.f32.mrb[7].mxu0 }
 0x16f   : > { %v1255_v32 = vpop.f32.mrb[7].mxu1  ;;  %v918_v33 = vadd.f32 %v1231_v27, %v878_v22 }
 0x171   : > { %v958_v34 = vadd.f32 %v1253_v28, %v918_v33 }
 0x173   : > { %v969_v36 = vmax.f32 %v958_v34, 0.0 }
 0x175   : > { %v977_v37 = vmul.f32 %v1166_v35, %v969_v36 }
 0x177   : > { %978 = vadd.xlane.f32.xlu0 %v977_v37 }
 0x204   : > { %v979_v38 = vpop.xlane.xlu0 %978 }
 0x205   : > { %981 = vst.msk [vmem:[%s251_s13] sm:$0xff] %vm980_vm0, %v979_v38 }
 0x206 PF: > { %s19_s22 = sadd.s32 1, %s1510_s22   ;;  %s1797_s27 = smov %s1804_s17 }
 0x207   : > { %p16_p5 = scmp.ge.s32.totalorder %s19_s22, 4   ;;  %s1798_s17 = smov %s1494_s18 }
 0x208   : > { %s1799_s18 = smov %s1498_s19  ;;  %s1800_s19 = smov %s1643_s29 }
 0x209   : > { %s1801_s20 = smov %s1506_s21  ;;  %s1802_s21 = smov %s1797_s27 }
 0x20a   :  { %18 = sbr.rel (!%p16_p5) target bundleno = 7 (0x7), region = 89 }
 0x211   :  { %1001 = vsyncpa [#allocation6], 1 }
 0x212   :  { %1003 = vsyncpa [#allocation6 + $0x1], 1 }
 0x213   :  { %1004 = vsyncpa [#allocation8], 1 }
 0x214   :  { %1006 = vsyncpa [#allocation8 + $0x1], 1 }

</bundles_post_ra>
